<compile_context>
chip_gen: v6e
topology: v6e:2x2x1
jax: 0.10.0
libtpu: 0.0.40
codegen_flags: <defaults>
</compile_context>

<pallas_src>
import functools

import jax
import jax.numpy as jnp
from jax import lax
from jax.experimental import pallas as pl
from jax.experimental.pallas import tpu as pltpu


def detection_head_kernel(x_ref, w_ref, b_ref, out_ref, *, num_classes):
    x = x_ref[...]                                                 # (tm, d)

    # Single fused matmul: (tm, d) @ (d, c_pad) -> (tm, c_pad) pre-activations.
    y = jnp.dot(x, w_ref[...], preferred_element_type=jnp.float32) + b_ref[...]

    tm, c_pad = y.shape
    lane = lax.broadcasted_iota(jnp.int32, (tm, c_pad), 1)
    is_cls = lane < num_classes
    is_cen = lane == num_classes
    is_bb = (lane > num_classes) & (lane < num_classes + 3)

    # One exp pass serves both the (max-shifted) softmax numerator and the
    # bbox torch.exp: class lanes get y - m, all other lanes keep y unchanged
    # so e == exp(y) exactly on the bbox lanes.
    m = jnp.max(jnp.where(is_cls, y, -jnp.inf), axis=-1, keepdims=True)
    e = jnp.exp(y - jnp.where(is_cls, m, 0.0))
    denom = jnp.sum(jnp.where(is_cls, e, 0.0), axis=-1, keepdims=True)
    probs = e / denom

    cen = jax.nn.sigmoid(y)   # only lane `num_classes` is kept

    out_ref[...] = jnp.where(
        is_cls, probs, jnp.where(is_cen, cen, jnp.where(is_bb, e, 0.0))
    )


def _fold_params(params, num_classes, c_pad):
    """Fold the five Linear layers into one (d, c_pad) affine map (done once)."""
    d_model = params["w_cc"].shape[0]

    w_cls_eff = params["w_cc"] @ params["w_cls"]                     # (d, nc)
    b_cls_eff = params["b_cc"] @ params["w_cls"] + params["b_cls"]   # (1, nc)
    w_cen_eff = params["w_cc"] @ params["w_cen"]                     # (d, 1)
    b_cen_eff = params["b_cc"] @ params["w_cen"] + params["b_cen"]   # (1, 1)
    w_bb_eff = params["w_reg"] @ params["w_bb"]                      # (d, 2)
    b_bb_eff = params["b_reg"] @ params["w_bb"] + params["b_bb"]     # (1, 2)

    w = jnp.zeros((d_model, c_pad), jnp.float32)
    w = w.at[:, 0:num_classes].set(w_cls_eff)
    w = w.at[:, num_classes:num_classes + 1].set(w_cen_eff)
    w = w.at[:, num_classes + 1:num_classes + 3].set(w_bb_eff)

    b = jnp.zeros((1, c_pad), jnp.float32)
    b = b.at[:, 0:num_classes].set(b_cls_eff)
    b = b.at[:, num_classes:num_classes + 1].set(b_cen_eff)
    b = b.at[:, num_classes + 1:num_classes + 3].set(b_bb_eff)
    return w, b


def detection_head(x, params, *, tm=1024):
    """x: (B, S, d_model) float32. Returns (classes, centerness, bbox)."""
    B, S, d_model = x.shape
    num_classes = params["w_cls"].shape[1]
    M = B * S
    c_pad = max(128, ((num_classes + 3 + 127) // 128) * 128)   # lane-dense output

    # Row tile: multiple of 8 sublanes; rows padded so the tile divides evenly.
    if M <= tm:
        tm_eff = ((M + 7) // 8) * 8
        m_pad = tm_eff
    else:
        tm_eff = tm
        m_pad = ((M + tm_eff - 1) // tm_eff) * tm_eff

    x2 = x.reshape(M, d_model)
    if m_pad != M:
        x2 = jnp.pad(x2, ((0, m_pad - M), (0, 0)))

    w_eff, b_eff = _fold_params(params, num_classes, c_pad)

    grid_spec = pltpu.PrefetchScalarGridSpec(
        num_scalar_prefetch=0,
        grid=(m_pad // tm_eff,),
        in_specs=[
            pl.BlockSpec((tm_eff, d_model), lambda i: (i, 0)),   # x rows
            pl.BlockSpec((d_model, c_pad), lambda i: (0, 0)),    # fused weight
            pl.BlockSpec((1, c_pad), lambda i: (0, 0)),          # fused bias
        ],
        out_specs=pl.BlockSpec((tm_eff, c_pad), lambda i: (i, 0)),
    )

    cost = pl.CostEstimate(
        flops=2 * m_pad * d_model * c_pad,
        transcendentals=2 * m_pad * c_pad,
        bytes_accessed=4 * (m_pad * d_model + m_pad * c_pad
                            + d_model * c_pad + c_pad),
    )

    out = pl.pallas_call(
        functools.partial(detection_head_kernel, num_classes=num_classes),
        out_shape=jax.ShapeDtypeStruct((m_pad, c_pad), jnp.float32),
        grid_spec=grid_spec,
        compiler_params=pltpu.CompilerParams(
            dimension_semantics=("parallel",),
        ),
        cost_estimate=cost,
    )(x2, w_eff, b_eff)

    classes = out[:M, 0:num_classes].reshape(B, S, num_classes)
    centerness = out[:M, num_classes:num_classes + 1].reshape(B, S, 1)
    bbox = out[:M, num_classes + 1:num_classes + 3].reshape(B, S, 2)
    return classes, centerness, bbox


def init_params(key, d_model, num_classes):
    """Deterministic synthetic params. Weights stored as (in, out); biases (1, out)."""
    ks = jax.random.split(key, 10)

    def lin(kw, kb, fan_in, fan_out):
        bound = 1.0 / jnp.sqrt(fan_in)
        w = jax.random.uniform(kw, (fan_in, fan_out), jnp.float32, -bound, bound)
        b = jax.random.uniform(kb, (1, fan_out), jnp.float32, -bound, bound)
        return w, b

    w_cc, b_cc = lin(ks[0], ks[1], d_model, d_model)
    w_cls, b_cls = lin(ks[2], ks[3], d_model, num_classes)
    w_cen, b_cen = lin(ks[4], ks[5], d_model, 1)
    w_reg, b_reg = lin(ks[6], ks[7], d_model, d_model)
    w_bb, b_bb = lin(ks[8], ks[9], d_model, 2)
    return dict(
        w_cc=w_cc, b_cc=b_cc,
        w_cls=w_cls, b_cls=b_cls,
        w_cen=w_cen, b_cen=b_cen,
        w_reg=w_reg, b_reg=b_reg,
        w_bb=w_bb, b_bb=b_bb,
    )


def detection_head_ref(x, params):
    """Pure-JAX reference mirroring the PyTorch forward exactly."""
    cls_center = x @ params["w_cc"] + params["b_cc"]
    classes = jax.nn.softmax(cls_center @ params["w_cls"] + params["b_cls"], axis=-1)
    centerness = jax.nn.sigmoid(cls_center @ params["w_cen"] + params["b_cen"])
    regression = x @ params["w_reg"] + params["b_reg"]
    bbox = jnp.exp(regression @ params["w_bb"] + params["b_bb"])
    return classes, centerness, bbox


if __name__ == "__main__":
    B, S, d_model, num_classes = 2, 8, 32, 16

    key = jax.random.PRNGKey(0)
    kx, kp = jax.random.split(key)
    x = jax.random.normal(kx, (B, S, d_model), jnp.float32)
    params = init_params(kp, d_model, num_classes)

    classes, centerness, bbox = jax.block_until_ready(detection_head(x, params))

    # Sanity check against the pure-JAX reference.
    classes_r, cent_r, bbox_r = detection_head_ref(x, params)
    assert jnp.allclose(classes, classes_r, atol=1e-5, rtol=1e-5)
    assert jnp.allclose(centerness, cent_r, atol=1e-5, rtol=1e-5)
    assert jnp.allclose(bbox, bbox_r, atol=1e-5, rtol=1e-5)

    print("KERNEL_OK")
</pallas_src>

<mosaic_0001>
module attributes {stable_mosaic.version = 11 : i64} {
  func.func @detection_head_kernel(%arg0: i32, %arg1: memref<16x32xf32, #tpu.memory_space<vmem>>, %arg2: memref<32x128xf32, #tpu.memory_space<vmem>>, %arg3: memref<1x128xf32, #tpu.memory_space<vmem>>, %arg4: memref<16x128xf32, #tpu.memory_space<vmem>>) attributes {dimension_semantics = [#tpu.dimension_semantics<parallel>], iteration_bounds = array<i64: 1>, scalar_prefetch = 0 : i64, scratch_operands = 0 : i64, tpu.core_type = #tpu.core_type<tc>, window_params = [{transform_indices = @transform_0, window_bounds = array<i64: 16, 32>}, {pipeline_mode = #tpu.pipeline_mode<synchronous>, transform_indices = @transform_1, window_bounds = array<i64: 32, 128>}, {pipeline_mode = #tpu.pipeline_mode<synchronous>, transform_indices = @transform_2, window_bounds = array<i64: 1, 128>}, {transform_indices = @transform_3, window_bounds = array<i64: 16, 128>}]} {
    %c0 = arith.constant 0 : index
    %c0_0 = arith.constant 0 : index
    %0 = vector.load %arg1[%c0, %c0_0] : memref<16x32xf32, #tpu.memory_space<vmem>>, vector<16x32xf32>
    %c0_1 = arith.constant 0 : index
    %c0_2 = arith.constant 0 : index
    %1 = vector.load %arg2[%c0_1, %c0_2] : memref<32x128xf32, #tpu.memory_space<vmem>>, vector<32x128xf32>
    %cst = arith.constant dense<0.000000e+00> : vector<16x128xf32>
    %2 = tpu.matmul %0, %1, %cst {dimension_numbers = #tpu.dot_dimension_numbers<[1], [0], [0], [1], [0, 0, 1, 1], [], []>} : vector<16x32xf32>, vector<32x128xf32>, vector<16x128xf32> -> vector<16x128xf32>
    %c0_3 = arith.constant 0 : index
    %c0_4 = arith.constant 0 : index
    %3 = vector.load %arg3[%c0_3, %c0_4] : memref<1x128xf32, #tpu.memory_space<vmem>>, vector<1x128xf32>
    %4 = vector.broadcast %3 : vector<1x128xf32> to vector<16x128xf32>
    %5 = arith.addf %2, %4 : vector<16x128xf32>
    %6 = tpu.iota {dimensions = array<i32: 1>} : vector<16x128xi32>
    %c16_i32 = arith.constant 16 : i32
    %7 = vector.broadcast %c16_i32 : i32 to vector<16x128xi32>
    %8 = arith.cmpi slt, %6, %7 : vector<16x128xi32>
    %c16_i32_5 = arith.constant 16 : i32
    %9 = vector.broadcast %c16_i32_5 : i32 to vector<16x128xi32>
    %10 = arith.cmpi eq, %6, %9 : vector<16x128xi32>
    %c16_i32_6 = arith.constant 16 : i32
    %11 = vector.broadcast %c16_i32_6 : i32 to vector<16x128xi32>
    %12 = arith.cmpi sgt, %6, %11 : vector<16x128xi32>
    %c19_i32 = arith.constant 19 : i32
    %13 = vector.broadcast %c19_i32 : i32 to vector<16x128xi32>
    %14 = arith.cmpi slt, %6, %13 : vector<16x128xi32>
    %15 = arith.andi %12, %14 : vector<16x128xi1>
    %cst_7 = arith.constant 0xFF800000 : f32
    %16 = vector.broadcast %cst_7 : f32 to vector<16x128xf32>
    %17 = arith.select %8, %5, %16 : vector<16x128xi1>, vector<16x128xf32>
    %cst_8 = arith.constant dense<0xFF800000> : vector<16xf32>
    %18 = vector.multi_reduction <maximumf>, %17, %cst_8 [1] : vector<16x128xf32> to vector<16xf32>
    %19 = vector.shape_cast %18 : vector<16xf32> to vector<16x1xf32>
    %cst_9 = arith.constant 0.000000e+00 : f32
    %20 = vector.shape_cast %19 : vector<16x1xf32> to vector<16x1xf32>
    %21 = vector.broadcast %20 : vector<16x1xf32> to vector<16x128xf32>
    %22 = vector.broadcast %cst_9 : f32 to vector<16x128xf32>
    %23 = arith.select %8, %21, %22 : vector<16x128xi1>, vector<16x128xf32>
    %24 = arith.subf %5, %23 : vector<16x128xf32>
    %25 = math.exp %24 : vector<16x128xf32>
    %cst_10 = arith.constant 0.000000e+00 : f32
    %26 = vector.broadcast %cst_10 : f32 to vector<16x128xf32>
    %27 = arith.select %8, %25, %26 : vector<16x128xi1>, vector<16x128xf32>
    %cst_11 = arith.constant dense<0.000000e+00> : vector<16xf32>
    %28 = vector.multi_reduction <add>, %27, %cst_11 [1] : vector<16x128xf32> to vector<16xf32>
    %29 = vector.shape_cast %28 : vector<16xf32> to vector<16x1xf32>
    %30 = vector.broadcast %29 : vector<16x1xf32> to vector<16x128xf32>
    %31 = arith.divf %25, %30 : vector<16x128xf32>
    %32 = arith.negf %5 : vector<16x128xf32>
    %33 = math.exp %32 : vector<16x128xf32>
    %cst_12 = arith.constant 1.000000e+00 : f32
    %34 = vector.broadcast %cst_12 : f32 to vector<16x128xf32>
    %35 = arith.addf %34, %33 : vector<16x128xf32>
    %36 = arith.divf %34, %35 : vector<16x128xf32>
    %cst_13 = arith.constant 0.000000e+00 : f32
    %37 = vector.broadcast %cst_13 : f32 to vector<16x128xf32>
    %38 = arith.select %15, %25, %37 : vector<16x128xi1>, vector<16x128xf32>
    %39 = arith.select %10, %36, %38 : vector<16x128xi1>, vector<16x128xf32>
    %40 = arith.select %8, %31, %39 : vector<16x128xi1>, vector<16x128xf32>
    %c0_14 = arith.constant 0 : index
    %c0_15 = arith.constant 0 : index
    %41 = vector.load %arg4[%c0_14, %c0_15] : memref<16x128xf32, #tpu.memory_space<vmem>>, vector<16x128xf32>
    tpu.vector_store %arg4[%c0_14, %c0_15], %40 {strides = array<i32>} : memref<16x128xf32, #tpu.memory_space<vmem>>, vector<16x128xf32>,
    return
  }
  func.func @transform_0(%arg0: i32) -> (i32, i32) {
    %c0_i32 = arith.constant 0 : i32
    %c0_i32_0 = arith.constant 0 : i32
    return %arg0, %c0_i32 : i32, i32
  }
  func.func @transform_1(%arg0: i32) -> (i32, i32) {
    %c0_i32 = arith.constant 0 : i32
    %c0_i32_0 = arith.constant 0 : i32
    %c0_i32_1 = arith.constant 0 : i32
    return %c0_i32, %c0_i32_0 : i32, i32
  }
  func.func @transform_2(%arg0: i32) -> (i32, i32) {
    %c0_i32 = arith.constant 0 : i32
    %c0_i32_0 = arith.constant 0 : i32
    %c0_i32_1 = arith.constant 0 : i32
    return %c0_i32, %c0_i32_0 : i32, i32
  }
  func.func @transform_3(%arg0: i32) -> (i32, i32) {
    %c0_i32 = arith.constant 0 : i32
    %c0_i32_0 = arith.constant 0 : i32
    return %arg0, %c0_i32 : i32, i32
  }
}

</mosaic_0001>

<bundles_post_ra>
// kernel: tpu_custom_call.1
= control target key start
LH: loop header
LB: loop body
LE: loop exit
PB: predicated region body
PF: predicated region fallthrough
CT: control target
= control target key end

     0   :  { %8 = vsyncpa [#allocation3], 0  ;;  %s380_s0 = inlined_call_operand.hbm [shape: f32[16,32], index: 0, kind: input, shape index: {}]   ;;  %s381_s1 = inlined_call_operand.hbm [shape: f32[32,128], index: 1, kind: input, shape index: {}]   ;;  %s382_s2 = inlined_call_operand.vmem [shape: f32[1,128], index: 2, kind: input, shape index: {}]   ;;  %s383_s3 = inlined_call_operand.hbm [shape: f32[16,128], index: 3, kind: output, shape index: {}]  }
   0x1   :  { %9 = vsyncpa [#allocation6], 0 }
   0x2   :  { %10 = vsyncpa [#allocation4], 0  ;;  %s316_s12 = smov [#allocation2]  }
   0x3   :  { %s16_s13 = sshll.u32 %s316_s12, 4  ;;  %s17_s13 = int_to_ptr.vmem [resolvable:$true] %s16_s13 }
   0x4   :  { %s258_s14 = scalar_lea.vmem %s17_s13, 256  ;;  %p263_p1 = scmp.lt.s32.totalorder %s17_s13, %s17_s13 }
   0x5   :  { %p259_p0 = scmp.ne.s32.totalorder %s17_s13, %s258_s14  ;;  %p264_p2 = scmp.lt.s32.totalorder %s258_s14, %s258_s14 }
   0x7   :  { %p265_p3 = por %p264_p2, %p263_p1 }
   0x9   :  { %p266_p4 = pnand %p265_p3, %p259_p0 }
   0xb   :  { %269 = shalt.err (!%p266_p4)
}
   0xc   :  { %s317_s15 = smov 128   ;;  %s318_s16 = smov 8  }
   0xd   :  { %22 = dma.hbm_to_vmem [thread:$0]  %s380_s0, 256, %s17_s13, [#allocation3], %s317_s15, %s317_s15, %s318_s16  }
   0xe   :  { %s319_s19 = smov [#allocation5]  }
   0xf   :  { %s28_s20 = sshll.u32 %s319_s19, 4  ;;  %s29_s20 = int_to_ptr.vmem [resolvable:$true] %s28_s20 }
  0x10   :  { %s278_s21 = scalar_lea.vmem %s29_s20, 512  ;;  %p283_p6 = scmp.lt.s32.totalorder %s29_s20, %s29_s20 }
  0x11   :  { %p279_p5 = scmp.ne.s32.totalorder %s29_s20, %s278_s21  ;;  %p284_p7 = scmp.lt.s32.totalorder %s278_s21, %s278_s21 }
  0x13   :  { %p285_p8 = por %p284_p7, %p283_p6 }
  0x15   :  { %p286_p9 = pnand %p285_p8, %p279_p5 }
  0x17   :  { %289 = shalt.err (!%p286_p9)
}
  0x18   :  { %34 = dma.hbm_to_vmem [thread:$0]  %s381_s1, 512, %s29_s20, [#allocation6], %s317_s15, %s317_s15, %s318_s16  }
  0x19   :  { %310 = dma.done.wait [#allocation3], 256  }
  0x1a   :  { %311 = vsyncadd [#allocation3], 4294967040 }
  0x1b   :  { %312 = dma.done.wait [#allocation6], 512  }
  0x1c   :  { %313 = vsyncadd [#allocation6], 4294966784  ;;  %vm56_vm0 = vcmask 261120   ;;  %v48_v0 = vld [vmem:[#allocation5 + $0x18] sm:$0xff]  ;;  %v47_v1 = vld [vmem:[#allocation5 + $0x10] sm:$0xff]  ;;  %v138_v6 = vlaneseq }
  0x1d   :  { %218 = vmatprep.subr.mxu0 %v48_v0  ;;  %v43_v2 = vld [vmem:[#allocation2] sm:$0xff]  ;;  %v46_v3 = vld [vmem:[#allocation5 + $0x8] sm:$0xff]  ;;  %v45_v4 = vld [vmem:[#allocation5] sm:$0xff] }
  0x1e   :  { %219 = vmatpush3.msra.mxu0 %v48_v0  ;;  %226 = vmatprep.mubr.msk.f32.mxu0 %vm56_vm0, %v43_v2  ;;  %v44_v5 = vld [vmem:[#allocation2 + $0x8] sm:$0xff]  ;;  %v139_v8 = vand.u32 127, %v138_v6  ;;  %v207_v9 = vld [vmem:[%s382_s2] ss:$0 sm:$0xff]  ;;  %s320_s2 = smov [#allocation7]  }
  0x1f   :  { %220 = vmatprep.subr.mxu0 %v47_v1  ;;  %s194_s24 = sshll.u32 %s320_s2, 4  ;;  %s195_s24 = int_to_ptr.vmem [resolvable:$true] %s194_s24 }
  0x20   :  { %221 = vmatpush3.msra.mxu0 %v47_v1  ;;  %vm140_vm1 = vcmp.lt.s32.totalorder %v139_v8, 16  ;;  %vm142_vm2 = vcmp.gt.s32.totalorder %v139_v8, 16  ;;  %vm143_vm3 = vcmp.lt.s32.totalorder %v139_v8, 19  ;;  %vm141_vm5 = vcmp.eq.s32.totalorder %v139_v8, 16  ;;  %s290_s25 = scalar_lea.vmem %s195_s24, 256  ;;  %p295_p11 = scmp.lt.s32.totalorder %s195_s24, %s195_s24 }
  0x21   :  { %222 = vmatprep.subr.mxu0 %v46_v3  ;;  %vm364_vm4 = vmand %vm142_vm2, %vm143_vm3  ;;  %p291_p10 = scmp.ne.s32.totalorder %s195_s24, %s290_s25  ;;  %p296_p12 = scmp.lt.s32.totalorder %s290_s25, %s290_s25 }
  0x22   :  { %223 = vmatpush3.msra.mxu0 %v46_v3 }
  0x23   :  { %224 = vmatprep.subr.mxu0 %v45_v4  ;;  %p297_p13 = por %p296_p12, %p295_p11 }
  0x24   :  { %225 = vmatpush3.msra.mxu0 %v45_v4 }
  0x25   :  { %227 = vmatmul.mubr.msk.f32.vlgmr.msra.gmra.mxu0 %vm56_vm0, %v44_v5  ;;  %p298_p0 = pnand %p297_p13, %p291_p10 }
  0xe5   :  { %v228_v7 = vpop.f32.mrf.mxu0 }
  0xe6   :  { %v135_v12 = vadd.f32 %v228_v7, %v207_v9 }
  0xe7   :  { %v129_v10 = vpop.f32.mrf.mxu0 }
  0xe8   :  { %v130_v11 = vadd.f32 %v207_v9, %v129_v10  ;;  %v146_v14 = vsel %vm140_vm1, %v135_v12, -inf  ;;  %v211_v28 = vmul.f32 -1.442695, %v135_v12 }
  0xea   :  { %v145_v13 = vsel %vm140_vm1, %v130_v11, -inf  ;;  %v210_v27 = vmul.f32 -1.442695, %v130_v11 }
  0xeb   :  { %147 = vmax.xlane.f32.xlu0 %v145_v13 }
  0xef   :  { %149 = vmax.xlane.f32.xlu0 %v146_v14 }
 0x174   :  { %v148_v15 = vpop.xlane.xlu0 %147 }
 0x175   :  { %v151_v16 = vsel %vm140_vm1, %v148_v15, 0.0 }
 0x176   :  { %v153_v17 = vsub.f32 %v130_v11, %v151_v16 }
 0x178   :  { %v155_v18 = vmul.f32 1.442695, %v153_v17  ;;  %v150_v19 = vpop.xlane.xlu0 %149 }
 0x179   :  { %v152_v20 = vsel %vm140_vm1, %v150_v19, 0.0 }
 0x17a   :  { %234 = vpow2.f32 %v155_v18  ;;  %v154_v21 = vsub.f32 %v135_v12, %v152_v20 }
 0x17c   :  { %v157_v22 = vmul.f32 1.442695, %v154_v21 }
 0x17e   :  { %236 = vpow2.f32 %v157_v22 }
 0x17f   :  { %238 = vpow2.f32 %v210_v27 }
 0x180   :  { %240 = vpow2.f32 %v211_v28 }
 0x187   :  { %v235_v23 = vpop.eup %234 }
 0x188   :  { %v159_v24 = vsel %vm140_vm1, %v235_v23, 0.0  ;;  %v181_v36 = vsel %vm364_vm4, %v235_v23, 0.0 }
 0x189   :  { %161 = vadd.xlane.f32.xlu1 %v159_v24 }
 0x18b   :  { %v237_v25 = vpop.eup %236 }
 0x18c   :  { %v160_v26 = vsel %vm140_vm1, %v237_v25, 0.0  ;;  %v239_v29 = vpop.eup %238  ;;  %v182_v41 = vsel %vm364_vm4, %v237_v25, 0.0 }
 0x18d   :  { %163 = vadd.xlane.f32.xlu1 %v160_v26  ;;  %v175_v30 = vadd.f32 1.0, %v239_v29  ;;  %v241_v31 = vpop.eup %240 }
 0x18e   :  { %v176_v33 = vadd.f32 1.0, %v241_v31 }
 0x212   :  { %v162_v32 = vpop.xlane.xlu1 %161 }
 0x213   :  { %242 = vrcp.f32 %v162_v32 }
 0x214   :  { %244 = vrcp.f32 %v175_v30 }
 0x216   :  { %v164_v34 = vpop.xlane.xlu1 %163 }
 0x217   :  { %246 = vrcp.f32 %v164_v34 }
 0x218   :  { %248 = vrcp.f32 %v176_v33 }
 0x220   :  { %v243_v37 = vpop.eup %242 }
 0x221   :  { %v245_v38 = vpop.eup %244  ;;  %v166_v39 = vmul.f32 %v243_v37, %v235_v23 }
 0x222   :  { %v183_v40 = vsel %vm141_vm5, %v245_v38, %v181_v36 }
 0x223   :  { %v185_v42 = vsel %vm140_vm1, %v166_v39, %v183_v40 }
 0x224   :  { %v247_v43 = vpop.eup %246  ;;  %187 = vst [vmem:[#allocation7] sm:$0xff] %v185_v42 }
 0x225   :  { %v249_v44 = vpop.eup %248  ;;  %v168_v45 = vmul.f32 %v247_v43, %v237_v25 }
 0x226   :  { %v184_v46 = vsel %vm141_vm5, %v249_v44, %v182_v41 }
 0x227   :  { %v186_v47 = vsel %vm140_vm1, %v168_v45, %v184_v46 }
 0x228   :  { %188 = vst [vmem:[#allocation7 + $0x8] sm:$0xff] %v186_v47 }
 0x229   :  { %301 = shalt.err (!%p298_p0)
}
 0x22a   :  { %200 = dma.vmem_to_hbm [thread:$0]  %s195_s24, 256, %s383_s3, [#allocation4], %s317_s15, %s317_s15, %s318_s16  }
 0x22b   :  { %314 = dma.done.wait [#allocation4], 256  }
 0x22c   :  { %315 = vsyncadd [#allocation4], 4294967040 }
 0x22d   :  { %204 = vsyncpa [#allocation3], 1 }
 0x22e   :  { %205 = vsyncpa [#allocation6], 1 }
 0x22f   :  { %206 = vsyncpa [#allocation4], 1 }

</bundles_post_ra>
